<compile_context>
chip_gen: v6e
topology: v6e:2x2x1
jax: 0.10.0
libtpu: 0.0.40
codegen_flags: <defaults>
</compile_context>

<pallas_src>
import numpy as np
import jax
import jax.numpy as jnp
from jax.experimental import pallas as pl
from jax.experimental.pallas import tpu as pltpu

# ----------------------------- configuration -------------------------------
IMG_SIZE = 16                 # args.img_size
WAVE_LENGTH = 5.32e-7         # actual_situation.wave_length
SCREEN_LENGTH = 8.0e-4        # actual_situation.screen_length
DISTANCE = 0.05               # actual_situation.distance


# ------------------------- parameter construction --------------------------
def build_diffractive_H(n, wave_length, screen_length, distance):
    """Replicates DiffractiveLayer.__init__ exactly (numpy, then fftshift)."""
    wave_num = 2 * 3.14159 / wave_length
    dx = screen_length / n
    fx_list = np.arange(-1 / (2 * dx), 1 / (2 * dx), 1 / screen_length)
    phi = np.fromfunction(
        lambda i, j: 1 - (np.square(wave_length * fx_list[i]) +
                          np.square(wave_length * fx_list[j])),
        shape=(n, n), dtype=np.int16).astype(np.complex64)
    H = np.exp(1j * wave_num * distance * np.sqrt(phi))
    H = np.fft.fftshift(H, axes=(0, 1)).astype(np.complex64)
    return H


def build_fused_operator(n, H):
    """Fold fftshift/fft2/H-mul/ifft2/ifftshift into one real block matrix.

    Row-major vec identity: vec(P X Q^T) = (P kron Q) vec(X), so with
      temp    = A X A^T      (A = F @ Pshift  -> fft2(fftshift(X)))
      k       = H * temp
      x_space = B K B^T      (B = Pshift @ conj(F) / n -> ifftshift(ifft2(K)))
    we get  vec(x_space) = M vec(X),  M = (B kron B) diag(vec(H)) (A kron A).
    The kernel computes [x_r | x_i] @ M_blk with the real block form of M^T.
    """
    idx = np.arange(n)
    F = np.exp(-2j * np.pi * np.outer(idx, idx) / n)          # complex128
    P = np.zeros((n, n), dtype=np.float64)
    P[idx, (idx + n // 2) % n] = 1.0                           # fftshift perm (even n)
    A = F @ P
    B = (P @ np.conj(F)) / n
    KA = np.kron(A, A)                                         # (n^2, n^2)
    KB = np.kron(B, B)
    M = KB @ (H.astype(np.complex128).reshape(-1)[:, None] * KA)
    MT = M.T
    M_blk = np.block([[MT.real, MT.imag],
                      [-MT.imag, MT.real]]).astype(np.float32)  # (2n^2, 2n^2)
    return M_blk


def quantize_dequantize(x, num_bits=8):
    # TODO(synk): utils.quantize_tensor/dequantize_tensor not provided; assume
    # the standard uint8 min/max affine quantization round-trip.
    qmin, qmax = 0.0, 2.0 ** num_bits - 1.0
    mn, mx = jnp.min(x), jnp.max(x)
    scale = jnp.maximum((mx - mn) / (qmax - qmin), 1e-12)
    zero_point = jnp.clip(jnp.round(qmin - mn / scale), qmin, qmax)
    q = jnp.clip(jnp.round(zero_point + x / scale), qmin, qmax)
    return scale * (q - zero_point)


def precompute_transmission_table(phase, delta_q):
    """Hoisted transcendentals, packed as one (16, n^2) f32 table.

    output[c] = cos(delta/2) + w_c * x_space[c]   (complex, per channel)
    with w_c = -i*sin(delta/2)*exp(i*sign_c*phase), sign_0=+1, sign_1=-1.
      rows 0/1 : Re(w_c) = sign_c * sin(delta/2)*sin(phase)
      row  8   : Im(w)   = -sin(delta/2)*cos(phase)   (same both channels)
      row  9   : cos(delta/2)
    """
    n2 = phase.size
    p = phase.reshape(n2)
    d2 = delta_q.reshape(n2) * 0.5
    nsin, ncos = jnp.sin(d2), jnp.cos(d2)
    sinp, cosp = jnp.sin(p), jnp.cos(p)
    tbl = jnp.zeros((16, n2), jnp.float32)
    tbl = tbl.at[0].set(nsin * sinp)       # channel 0 (geometry mask +1)
    tbl = tbl.at[1].set(-nsin * sinp)      # channel 1 (geometry mask -1)
    tbl = tbl.at[8].set(-nsin * cosp)
    tbl = tbl.at[9].set(ncos)
    return tbl


# ------------------------------ Pallas kernel -------------------------------
def dt_layer_kernel(x_ref, m_ref, t_ref, o_ref):
    n2 = o_ref.shape[1] // 2
    # One bf16 MXU pass: [x_r | x_i] @ [[M^T_r, M^T_i], [-M^T_i, M^T_r]]
    s = jnp.dot(x_ref[...], m_ref[...], preferred_element_type=jnp.float32)
    sr = s[:, :n2]                 # Re(x_space), rows = channels (+padding)
    si = s[:, n2:]                 # Im(x_space)
    wr = t_ref[0:8, :]             # per-channel Re(w)
    wi = t_ref[8:9, :]             # Im(w), broadcast over rows
    ncos = t_ref[9:10, :]          # cos(delta/2), broadcast over rows
    # output = cos(delta/2) + w * x_space
    o_ref[:, :n2] = ncos + wr * sr - wi * si
    o_ref[:, n2:] = wr * si + wi * sr


def dt_layer_forward(x_re, x_im, m_blk_bf16, trans_tbl):
    c, n, _ = x_re.shape
    n2 = n * n
    # Pack both channels' real|imag planes into one lane-dense (8, 2*n2) slab.
    x_flat = jnp.concatenate([x_re.reshape(c, n2), x_im.reshape(c, n2)], axis=1)
    x_pack = jnp.zeros((8, 2 * n2), jnp.float32).at[:c].set(x_flat)
    x_pack = x_pack.astype(jnp.bfloat16)

    out = pl.pallas_call(
        dt_layer_kernel,
        out_shape=jax.ShapeDtypeStruct((8, 2 * n2), jnp.float32),
        grid=(1,),
        in_specs=[pl.BlockSpec((8, 2 * n2), lambda i: (0, 0)),
                  pl.BlockSpec((2 * n2, 2 * n2), lambda i: (0, 0)),
                  pl.BlockSpec((16, n2), lambda i: (0, 0))],
        out_specs=pl.BlockSpec((8, 2 * n2), lambda i: (0, 0)),
        compiler_params=pltpu.CompilerParams(
            dimension_semantics=("arbitrary",)),
    )(x_pack, m_blk_bf16, trans_tbl)

    out_re = out[:c, :n2].reshape(c, n, n)
    out_im = out[:c, n2:].reshape(c, n, n)
    return out_re, out_im


# ------------------------------ pure-JAX reference ---------------------------
def dt_layer_ref(x_c, H_c, phase, delta_q):
    n = x_c.shape[-1]
    temp = jnp.fft.fft2(jnp.fft.fftshift(x_c, axes=(1, 2)), axes=(1, 2))
    k_space = temp * H_c[None]
    x_space = jnp.fft.ifftshift(jnp.fft.ifft2(k_space, axes=(1, 2)), axes=(1, 2))

    g = jnp.stack([jnp.ones((n, n)), -jnp.ones((n, n))], 0).astype(jnp.float32)
    new_phase = g * phase[None]
    mask = jnp.cos(new_phase) + 1j * jnp.sin(new_phase)
    temp2 = x_space * mask
    ncos = jnp.cos(delta_q / 2).astype(jnp.complex64)
    nsin = jnp.sin(delta_q / 2).astype(jnp.complex64)
    out = ncos[None] - 1j * nsin[None] * temp2
    return out


# ----------------------------------- main ------------------------------------
if __name__ == "__main__":
    N = IMG_SIZE
    key = jax.random.PRNGKey(0)
    k_xr, k_xi, k_phase, k_delta = jax.random.split(key, 4)

    # input complex field, shape [2, N, N]  (real / imag planes)
    x_re = jax.random.normal(k_xr, (2, N, N), dtype=jnp.float32)
    x_im = jax.random.normal(k_xi, (2, N, N), dtype=jnp.float32)

    # DiffractiveLayer fixed transfer function H  ->  fused 512x512 operator
    H_np = build_diffractive_H(N, WAVE_LENGTH, SCREEN_LENGTH, DISTANCE)
    M_blk = jnp.asarray(build_fused_operator(N, H_np), dtype=jnp.bfloat16)

    # TransmissionLayer learnable params (deterministic init)
    # TODO(synk): dropout is defined but never applied in forward, and the
    # manufacturing_error branch's result is overwritten; both are skipped.
    phase = (2 * np.pi) * jax.random.uniform(k_phase, (N, N), dtype=jnp.float32)
    delta = (2 * np.pi) * jax.random.uniform(k_delta, (N, N), dtype=jnp.float32)
    delta_q = quantize_dequantize(delta)   # dequantize(quantize(delta))

    trans_tbl = precompute_transmission_table(phase, delta_q)

    fwd = jax.jit(dt_layer_forward)
    out_re, out_im = fwd(x_re, x_im, M_blk, trans_tbl)
    jax.block_until_ready((out_re, out_im))

    # sanity check vs pure-JAX / jnp.fft reference
    # (tolerance accounts for single-pass bf16 MXU operands, per perf review)
    x_c = (x_re + 1j * x_im).astype(jnp.complex64)
    H_c = jnp.asarray(H_np)
    ref = dt_layer_ref(x_c, H_c, phase, delta_q)
    np.testing.assert_allclose(np.asarray(out_re), np.asarray(ref.real),
                               rtol=2e-2, atol=2e-2)
    np.testing.assert_allclose(np.asarray(out_im), np.asarray(ref.imag),
                               rtol=2e-2, atol=2e-2)

    print("KERNEL_OK")
</pallas_src>

<mosaic_0001>
module attributes {stable_mosaic.version = 11 : i64} {
  func.func @dt_layer_kernel(%arg0: i32, %arg1: memref<8x512xbf16, #tpu.memory_space<vmem>>, %arg2: memref<512x512xbf16, #tpu.memory_space<vmem>>, %arg3: memref<16x256xf32, #tpu.memory_space<vmem>>, %arg4: memref<8x512xf32, #tpu.memory_space<vmem>>) attributes {dimension_semantics = [#tpu.dimension_semantics<arbitrary>], iteration_bounds = array<i64: 1>, scalar_prefetch = 0 : i64, scratch_operands = 0 : i64, tpu.core_type = #tpu.core_type<tc>, window_params = [{pipeline_mode = #tpu.pipeline_mode<synchronous>, transform_indices = @transform_0, window_bounds = array<i64: 8, 512>}, {pipeline_mode = #tpu.pipeline_mode<synchronous>, transform_indices = @transform_1, window_bounds = array<i64: 512, 512>}, {pipeline_mode = #tpu.pipeline_mode<synchronous>, transform_indices = @transform_2, window_bounds = array<i64: 16, 256>}, {pipeline_mode = #tpu.pipeline_mode<synchronous>, transform_indices = @transform_3, window_bounds = array<i64: 8, 512>}]} {
    %c0 = arith.constant 0 : index
    %c0_0 = arith.constant 0 : index
    %0 = vector.load %arg1[%c0, %c0_0] : memref<8x512xbf16, #tpu.memory_space<vmem>>, vector<8x512xbf16>
    %c0_1 = arith.constant 0 : index
    %c0_2 = arith.constant 0 : index
    %1 = vector.load %arg2[%c0_1, %c0_2] : memref<512x512xbf16, #tpu.memory_space<vmem>>, vector<512x512xbf16>
    %cst = arith.constant dense<0.000000e+00> : vector<8x512xf32>
    %2 = tpu.matmul %0, %1, %cst {dimension_numbers = #tpu.dot_dimension_numbers<[1], [0], [0], [1], [0, 0, 1, 1], [], []>} : vector<8x512xbf16>, vector<512x512xbf16>, vector<8x512xf32> -> vector<8x512xf32>
    %3 = vector.extract_strided_slice %2 {offsets = [0, 0], sizes = [8, 256], strides = [1, 1]} : vector<8x512xf32> to vector<8x256xf32>
    %4 = vector.extract_strided_slice %2 {offsets = [0, 256], sizes = [8, 256], strides = [1, 1]} : vector<8x512xf32> to vector<8x256xf32>
    %c0_3 = arith.constant 0 : index
    %c0_4 = arith.constant 0 : index
    %5 = vector.load %arg3[%c0_3, %c0_4] : memref<16x256xf32, #tpu.memory_space<vmem>>, vector<8x256xf32>
    %c8 = arith.constant 8 : index
    %c0_5 = arith.constant 0 : index
    %6 = vector.load %arg3[%c8, %c0_5] : memref<16x256xf32, #tpu.memory_space<vmem>>, vector<1x256xf32>
    %c9 = arith.constant 9 : index
    %c0_6 = arith.constant 0 : index
    %7 = vector.load %arg3[%c9, %c0_6] : memref<16x256xf32, #tpu.memory_space<vmem>>, vector<1x256xf32>
    %8 = arith.mulf %5, %3 : vector<8x256xf32>
    %9 = vector.broadcast %7 : vector<1x256xf32> to vector<8x256xf32>
    %10 = arith.addf %9, %8 : vector<8x256xf32>
    %11 = vector.broadcast %6 : vector<1x256xf32> to vector<8x256xf32>
    %12 = arith.mulf %11, %4 : vector<8x256xf32>
    %13 = arith.subf %10, %12 : vector<8x256xf32>
    %c0_7 = arith.constant 0 : index
    %c0_8 = arith.constant 0 : index
    %14 = vector.load %arg4[%c0_7, %c0_8] : memref<8x512xf32, #tpu.memory_space<vmem>>, vector<8x256xf32>
    tpu.vector_store %arg4[%c0_7, %c0_8], %13 {strides = array<i32>} : memref<8x512xf32, #tpu.memory_space<vmem>>, vector<8x256xf32>,
    %15 = arith.mulf %5, %4 : vector<8x256xf32>
    %16 = vector.broadcast %6 : vector<1x256xf32> to vector<8x256xf32>
    %17 = arith.mulf %16, %3 : vector<8x256xf32>
    %18 = arith.addf %15, %17 : vector<8x256xf32>
    %c0_9 = arith.constant 0 : index
    %c256 = arith.constant 256 : index
    %19 = vector.load %arg4[%c0_9, %c256] : memref<8x512xf32, #tpu.memory_space<vmem>>, vector<8x256xf32>
    tpu.vector_store %arg4[%c0_9, %c256], %18 {strides = array<i32>} : memref<8x512xf32, #tpu.memory_space<vmem>>, vector<8x256xf32>,
    return
  }
  func.func @transform_0(%arg0: i32) -> (i32, i32) {
    %c0_i32 = arith.constant 0 : i32
    %c0_i32_0 = arith.constant 0 : i32
    %c0_i32_1 = arith.constant 0 : i32
    return %c0_i32, %c0_i32_0 : i32, i32
  }
  func.func @transform_1(%arg0: i32) -> (i32, i32) {
    %c0_i32 = arith.constant 0 : i32
    %c0_i32_0 = arith.constant 0 : i32
    %c0_i32_1 = arith.constant 0 : i32
    return %c0_i32, %c0_i32_0 : i32, i32
  }
  func.func @transform_2(%arg0: i32) -> (i32, i32) {
    %c0_i32 = arith.constant 0 : i32
    %c0_i32_0 = arith.constant 0 : i32
    %c0_i32_1 = arith.constant 0 : i32
    return %c0_i32, %c0_i32_0 : i32, i32
  }
  func.func @transform_3(%arg0: i32) -> (i32, i32) {
    %c0_i32 = arith.constant 0 : i32
    %c0_i32_0 = arith.constant 0 : i32
    %c0_i32_1 = arith.constant 0 : i32
    return %c0_i32, %c0_i32_0 : i32, i32
  }
}

</mosaic_0001>

<bundles_post_ra>
// kernel: dt_layer_forward.1
= control target key start
LH: loop header
LB: loop body
LE: loop exit
PB: predicated region body
PF: predicated region fallthrough
CT: control target
= control target key end

     0   :  { %8 = vsyncpa [#allocation3], 0  ;;  %s1382_s12 = smov [#allocation2]   ;;  %s1450_s0 = inlined_call_operand.vmem [shape: bf16[8,512], index: 0, kind: input, shape index: {}]   ;;  %s1451_s1 = inlined_call_operand.hbm [shape: bf16[512,512], index: 1, kind: input, shape index: {}]   ;;  %s1452_s2 = inlined_call_operand.vmem [shape: f32[16,256], index: 2, kind: input, shape index: {}]   ;;  %s1453_s3 = inlined_call_operand.vmem [shape: f32[8,512], index: 3, kind: output, shape index: {}]  }
   0x1   :  { %s16_s13 = sshll.u32 %s1382_s12, 4  ;;  %s17_s13 = int_to_ptr.vmem [resolvable:$true] %s16_s13 }
   0x2   :  { %s1368_s14 = scalar_lea.vmem %s17_s13, 16384  ;;  %p1373_p1 = scmp.lt.s32.totalorder %s17_s13, %s17_s13 }
   0x3   :  { %p1369_p0 = scmp.ne.s32.totalorder %s17_s13, %s1368_s14  ;;  %p1374_p2 = scmp.lt.s32.totalorder %s1368_s14, %s1368_s14 }
   0x5   :  { %p1375_p3 = por %p1374_p2, %p1373_p1 }
   0x7   :  { %p1376_p4 = pnand %p1375_p3, %p1369_p0 }
   0x9   :  { %1379 = shalt.err (!%p1376_p4)
}
   0xa   :  { %s1383_s15 = smov 256   ;;  %s1384_s16 = smov 16  }
   0xb   :  { %22 = dma.hbm_to_vmem [thread:$0]  %s1451_s1, 16384, %s17_s13, [#allocation3], %s1383_s15, %s1383_s15, %s1384_s16  }
   0xc   :  { %1380 = dma.done.wait [#allocation3], 16384  }
   0xd   :  { %1381 = vsyncadd [#allocation3], 4294950912  ;;  %v1164_v0 = vld [vmem:[#allocation2 + $0xe4] ss:$16 sps:$4 sm:$0xff]   ;;  %v1168_v2 = vld [vmem:[#allocation2 + $0xe0] ss:$16 sps:$4 sm:$0xff]  }
   0xe   :  { %v1166_v1 = vld [vmem:[#allocation2 + $0x2e4] ss:$16 sps:$4 sm:$0xff]   ;;  %812 = vmatprep.subr.bf16.mxu0 %v1164_v0  ;;  %v1169_v3 = vld [vmem:[#allocation2 + $0x2e0] ss:$16 sps:$4 sm:$0xff]   ;;  %v29_v48 = vld [vmem:[%s1450_s0 + $0x8] sm:$0xff] }
   0xf   :  { %853 = vmatprep.subr.bf16.mxu1 %v1166_v1  ;;  %v1170_v4 = vld [vmem:[#allocation2 + $0xc4] ss:$16 sps:$4 sm:$0xff]   ;;  %813 = vmatpush1.bf16.msra.mxu0 %v1168_v2  ;;  %v1174_v6 = vld [vmem:[#allocation2 + $0xc0] ss:$16 sps:$4 sm:$0xff]   ;;  %v1030_v51 = vcombine.high %v29_v48, %v29_v48 }
  0x10   :  { %854 = vmatpush1.bf16.msra.mxu1 %v1169_v3  ;;  %v1172_v5 = vld [vmem:[#allocation2 + $0x2c4] ss:$16 sps:$4 sm:$0xff]   ;;  %814 = vmatprep.subr.bf16.mxu0 %v1170_v4  ;;  %v1175_v7 = vld [vmem:[#allocation2 + $0x2c0] ss:$16 sps:$4 sm:$0xff]   ;;  %v1266_v4 = vld [vmem:[#allocation2 + $0xec] ss:$16 sps:$4 sm:$0xff]  }
  0x11   :  { %855 = vmatprep.subr.bf16.mxu1 %v1172_v5  ;;  %v1176_v8 = vld [vmem:[#allocation2 + $0xa4] ss:$16 sps:$4 sm:$0xff]   ;;  %v1180_v10 = vld [vmem:[#allocation2 + $0xa0] ss:$16 sps:$4 sm:$0xff]   ;;  %885 = vmatprep.mubr.bf16.mxu1 %v1030_v51  ;;  %v1269_v5 = vld [vmem:[#allocation2 + $0x2ec] ss:$16 sps:$4 sm:$0xff]  }
  0x12   :  { %v1178_v9 = vld [vmem:[#allocation2 + $0x2a4] ss:$16 sps:$4 sm:$0xff]   ;;  %v1181_v11 = vld [vmem:[#allocation2 + $0x2a0] ss:$16 sps:$4 sm:$0xff]  }
  0x13   :  { %815 = vmatpush1.bf16.msra.mxu0 %v1174_v6  ;;  %v1182_v12 = vld [vmem:[#allocation2 + $0x84] ss:$16 sps:$4 sm:$0xff]   ;;  %v1186_v14 = vld [vmem:[#allocation2 + $0x80] ss:$16 sps:$4 sm:$0xff]  }
  0x14   :  { %856 = vmatpush1.bf16.msra.mxu1 %v1175_v7  ;;  %816 = vmatprep.subr.bf16.mxu0 %v1176_v8  ;;  %v1184_v13 = vld [vmem:[#allocation2 + $0x284] ss:$16 sps:$4 sm:$0xff]   ;;  %v1187_v15 = vld [vmem:[#allocation2 + $0x280] ss:$16 sps:$4 sm:$0xff]   ;;  %v1419_v7 = vcombine.low %v29_v48, %v29_v48  ;;  %v1264_v8 = vld [vmem:[#allocation2 + $0xe8] ss:$16 sps:$4 sm:$0xff]  }
  0x15   :  { %857 = vmatprep.subr.bf16.mxu1 %v1178_v9  ;;  %v1188_v16 = vld [vmem:[#allocation2 + $0x64] ss:$16 sps:$4 sm:$0xff]   ;;  %v1192_v18 = vld [vmem:[#allocation2 + $0x60] ss:$16 sps:$4 sm:$0xff]   ;;  %v1267_v9 = vld [vmem:[#allocation2 + $0x2e8] ss:$16 sps:$4 sm:$0xff]  }
  0x16   :  { %v1190_v17 = vld [vmem:[#allocation2 + $0x264] ss:$16 sps:$4 sm:$0xff]   ;;  %v1193_v19 = vld [vmem:[#allocation2 + $0x260] ss:$16 sps:$4 sm:$0xff]   ;;  %v1324_v48 = vld [vmem:[#allocation2 + $0x1a8] ss:$16 sps:$4 sm:$0xff]  }
  0x17   :  { %817 = vmatpush1.bf16.msra.mxu0 %v1180_v10  ;;  %v1194_v20 = vld [vmem:[#allocation2 + $0x44] ss:$16 sps:$4 sm:$0xff]   ;;  %v1198_v22 = vld [vmem:[#allocation2 + $0x40] ss:$16 sps:$4 sm:$0xff]   ;;  %v1272_v10 = vld [vmem:[#allocation2 + $0xcc] ss:$16 sps:$4 sm:$0xff]  }
  0x18   :  { %858 = vmatpush1.bf16.msra.mxu1 %v1181_v11  ;;  %818 = vmatprep.subr.bf16.mxu0 %v1182_v12  ;;  %v1196_v21 = vld [vmem:[#allocation2 + $0x244] ss:$16 sps:$4 sm:$0xff]   ;;  %v1199_v23 = vld [vmem:[#allocation2 + $0x240] ss:$16 sps:$4 sm:$0xff]   ;;  %v1275_v11 = vld [vmem:[#allocation2 + $0x2cc] ss:$16 sps:$4 sm:$0xff]  }
  0x19   :  { %859 = vmatprep.subr.bf16.mxu1 %v1184_v13  ;;  %v1200_v24 = vld [vmem:[#allocation2 + $0x24] ss:$16 sps:$4 sm:$0xff]   ;;  %v1204_v26 = vld [vmem:[#allocation2 + $0x20] ss:$16 sps:$4 sm:$0xff]   ;;  %v1270_v12 = vld [vmem:[#allocation2 + $0xc8] ss:$16 sps:$4 sm:$0xff]  }
  0x1a   :  { %v1202_v25 = vld [vmem:[#allocation2 + $0x224] ss:$16 sps:$4 sm:$0xff]   ;;  %v1205_v27 = vld [vmem:[#allocation2 + $0x220] ss:$16 sps:$4 sm:$0xff]   ;;  %v1273_v13 = vld [vmem:[#allocation2 + $0x2c8] ss:$16 sps:$4 sm:$0xff]  }
  0x1b   :  { %819 = vmatpush1.bf16.msra.mxu0 %v1186_v14  ;;  %v1206_v28 = vld [vmem:[#allocation2 + $0x4] ss:$16 sps:$4 sm:$0xff]   ;;  %v1210_v30 = vld [vmem:[#allocation2] ss:$16 sps:$4 sm:$0xff]   ;;  %v1278_v14 = vld [vmem:[#allocation2 + $0xac] ss:$16 sps:$4 sm:$0xff]  }
  0x1c   :  { %860 = vmatpush1.bf16.msra.mxu1 %v1187_v15  ;;  %820 = vmatprep.subr.bf16.mxu0 %v1188_v16  ;;  %v1208_v29 = vld [vmem:[#allocation2 + $0x204] ss:$16 sps:$4 sm:$0xff]   ;;  %v1211_v31 = vld [vmem:[#allocation2 + $0x200] ss:$16 sps:$4 sm:$0xff]   ;;  %v1281_v15 = vld [vmem:[#allocation2 + $0x2ac] ss:$16 sps:$4 sm:$0xff]  }
  0x1d   :  { %861 = vmatprep.subr.bf16.mxu1 %v1190_v17  ;;  %v1212_v32 = vld [vmem:[#allocation2 + $0x1e4] ss:$16 sps:$4 sm:$0xff]   ;;  %v1216_v34 = vld [vmem:[#allocation2 + $0x1e0] ss:$16 sps:$4 sm:$0xff]   ;;  %v1276_v16 = vld [vmem:[#allocation2 + $0xa8] ss:$16 sps:$4 sm:$0xff]  }
  0x1e   :  { %v1214_v33 = vld [vmem:[#allocation2 + $0x3e4] ss:$16 sps:$4 sm:$0xff]   ;;  %v1217_v35 = vld [vmem:[#allocation2 + $0x3e0] ss:$16 sps:$4 sm:$0xff]   ;;  %v1279_v17 = vld [vmem:[#allocation2 + $0x2a8] ss:$16 sps:$4 sm:$0xff]  }
  0x1f   :  { %821 = vmatpush1.bf16.msra.mxu0 %v1192_v18  ;;  %v1218_v36 = vld [vmem:[#allocation2 + $0x1c4] ss:$16 sps:$4 sm:$0xff]   ;;  %v1222_v38 = vld [vmem:[#allocation2 + $0x1c0] ss:$16 sps:$4 sm:$0xff]   ;;  %v1284_v18 = vld [vmem:[#allocation2 + $0x8c] ss:$16 sps:$4 sm:$0xff]  }
  0x20   :  { %862 = vmatpush1.bf16.msra.mxu1 %v1193_v19  ;;  %822 = vmatprep.subr.bf16.mxu0 %v1194_v20  ;;  %v1220_v37 = vld [vmem:[#allocation2 + $0x3c4] ss:$16 sps:$4 sm:$0xff]   ;;  %v1223_v39 = vld [vmem:[#allocation2 + $0x3c0] ss:$16 sps:$4 sm:$0xff]   ;;  %v1287_v19 = vld [vmem:[#allocation2 + $0x28c] ss:$16 sps:$4 sm:$0xff]  }
  0x21   :  { %863 = vmatprep.subr.bf16.mxu1 %v1196_v21  ;;  %v1224_v40 = vld [vmem:[#allocation2 + $0x1a4] ss:$16 sps:$4 sm:$0xff]   ;;  %v1228_v42 = vld [vmem:[#allocation2 + $0x1a0] ss:$16 sps:$4 sm:$0xff]   ;;  %v1282_v20 = vld [vmem:[#allocation2 + $0x88] ss:$16 sps:$4 sm:$0xff]  }
  0x22   :  { %v1226_v41 = vld [vmem:[#allocation2 + $0x3a4] ss:$16 sps:$4 sm:$0xff]   ;;  %v1229_v43 = vld [vmem:[#allocation2 + $0x3a0] ss:$16 sps:$4 sm:$0xff]   ;;  %v1285_v21 = vld [vmem:[#allocation2 + $0x288] ss:$16 sps:$4 sm:$0xff]  }
  0x23   :  { %823 = vmatpush1.bf16.msra.mxu0 %v1198_v22  ;;  %v1230_v44 = vld [vmem:[#allocation2 + $0x184] ss:$16 sps:$4 sm:$0xff]   ;;  %v1234_v49 = vld [vmem:[#allocation2 + $0x180] ss:$16 sps:$4 sm:$0xff]   ;;  %v1290_v22 = vld [vmem:[#allocation2 + $0x6c] ss:$16 sps:$4 sm:$0xff]  }
  0x24   :  { %864 = vmatpush1.bf16.msra.mxu1 %v1199_v23  ;;  %824 = vmatprep.subr.bf16.mxu0 %v1200_v24  ;;  %v1232_v45 = vld [vmem:[#allocation2 + $0x384] ss:$16 sps:$4 sm:$0xff]   ;;  %v1235_v50 = vld [vmem:[#allocation2 + $0x380] ss:$16 sps:$4 sm:$0xff]   ;;  %v1293_v23 = vld [vmem:[#allocation2 + $0x26c] ss:$16 sps:$4 sm:$0xff]  }
  0x25   :  { %865 = vmatprep.subr.bf16.mxu1 %v1202_v25  ;;  %v28_v46 = vld [vmem:[%s1450_s0] sm:$0xff]  ;;  %v1288_v24 = vld [vmem:[#allocation2 + $0x68] ss:$16 sps:$4 sm:$0xff]  }
  0x26   :  { %v1411_v47 = vcombine.high %v28_v46, %v28_v46  ;;  %v1236_v52 = vld [vmem:[#allocation2 + $0x164] ss:$16 sps:$4 sm:$0xff]   ;;  %v1240_v54 = vld [vmem:[#allocation2 + $0x160] ss:$16 sps:$4 sm:$0xff]   ;;  %v1417_v6 = vcombine.low %v28_v46, %v28_v46  ;;  %v1291_v25 = vld [vmem:[#allocation2 + $0x268] ss:$16 sps:$4 sm:$0xff]  }
  0x27   :  { %825 = vmatpush1.bf16.msra.mxu0 %v1204_v26  ;;  %v1238_v53 = vld [vmem:[#allocation2 + $0x364] ss:$16 sps:$4 sm:$0xff]   ;;  %v1241_v55 = vld [vmem:[#allocation2 + $0x360] ss:$16 sps:$4 sm:$0xff]   ;;  %v1296_v26 = vld [vmem:[#allocation2 + $0x4c] ss:$16 sps:$4 sm:$0xff]  }
  0x28   :  { %866 = vmatpush1.bf16.msra.mxu1 %v1205_v27  ;;  %826 = vmatprep.subr.bf16.mxu0 %v1206_v28  ;;  %v1242_v56 = vld [vmem:[#allocation2 + $0x144] ss:$16 sps:$4 sm:$0xff]   ;;  %v1246_v58 = vld [vmem:[#allocation2 + $0x140] ss:$16 sps:$4 sm:$0xff]   ;;  %v1299_v27 = vld [vmem:[#allocation2 + $0x24c] ss:$16 sps:$4 sm:$0xff]  }
  0x29   :  { %867 = vmatprep.subr.bf16.mxu1 %v1208_v29  ;;  %844 = vmatprep.mubr.bf16.mxu0 %v1411_v47  ;;  %v1244_v57 = vld [vmem:[#allocation2 + $0x344] ss:$16 sps:$4 sm:$0xff]   ;;  %v1247_v59 = vld [vmem:[#allocation2 + $0x340] ss:$16 sps:$4 sm:$0xff]   ;;  %v1294_v28 = vld [vmem:[#allocation2 + $0x48] ss:$16 sps:$4 sm:$0xff]  }
  0x2a   :  { %v1248_v60 = vld [vmem:[#allocation2 + $0x124] ss:$16 sps:$4 sm:$0xff]   ;;  %v1252_v62 = vld [vmem:[#allocation2 + $0x120] ss:$16 sps:$4 sm:$0xff]   ;;  %v1297_v29 = vld [vmem:[#allocation2 + $0x248] ss:$16 sps:$4 sm:$0xff]  }
  0x2b   :  { %827 = vmatpush1.bf16.msra.mxu0 %v1210_v30  ;;  %v1250_v61 = vld [vmem:[#allocation2 + $0x324] ss:$16 sps:$4 sm:$0xff]   ;;  %v1253_v63 = vld [vmem:[#allocation2 + $0x320] ss:$16 sps:$4 sm:$0xff]   ;;  %v1302_v30 = vld [vmem:[#allocation2 + $0x2c] ss:$16 sps:$4 sm:$0xff]  }
  0x2c   :  { %868 = vmatpush1.bf16.msra.mxu1 %v1211_v31  ;;  %828 = vmatprep.subr.bf16.mxu0 %v1212_v32  ;;  %v1254_v0 = vld [vmem:[#allocation2 + $0x104] ss:$16 sps:$4 sm:$0xff]   ;;  %v1258_v2 = vld [vmem:[#allocation2 + $0x100] ss:$16 sps:$4 sm:$0xff]   ;;  %v1305_v31 = vld [vmem:[#allocation2 + $0x22c] ss:$16 sps:$4 sm:$0xff]  }
  0x2d   :  { %869 = vmatprep.subr.bf16.mxu1 %v1214_v33  ;;  %v1256_v1 = vld [vmem:[#allocation2 + $0x304] ss:$16 sps:$4 sm:$0xff]   ;;  %v1259_v3 = vld [vmem:[#allocation2 + $0x300] ss:$16 sps:$4 sm:$0xff]   ;;  %v1300_v32 = vld [vmem:[#allocation2 + $0x28] ss:$16 sps:$4 sm:$0xff]  }
  0x2e   :  { %v1303_v33 = vld [vmem:[#allocation2 + $0x228] ss:$16 sps:$4 sm:$0xff]   ;;  %v1326_v46 = vld [vmem:[#allocation2 + $0x1ac] ss:$16 sps:$4 sm:$0xff]  }
  0x2f   :  { %829 = vmatpush2.bf16.msra.mxu0 %v1216_v34  ;;  %v1308_v34 = vld [vmem:[#allocation2 + $0xc] ss:$16 sps:$4 sm:$0xff]  }
  0x30   :  { %870 = vmatpush2.bf16.msra.mxu1 %v1217_v35  ;;  %830 = vmatprep.subr.bf16.mxu0 %v1218_v36  ;;  %v1311_v35 = vld [vmem:[#allocation2 + $0x20c] ss:$16 sps:$4 sm:$0xff]   ;;  %v1306_v36 = vld [vmem:[#allocation2 + $0x8] ss:$16 sps:$4 sm:$0xff]  }
  0x31   :  { %871 = vmatprep.subr.bf16.mxu1 %v1220_v37  ;;  %v1309_v37 = vld [vmem:[#allocation2 + $0x208] ss:$16 sps:$4 sm:$0xff]  }
  0x33   :  { %831 = vmatpush2.bf16.msra.mxu0 %v1222_v38  ;;  %v1314_v38 = vld [vmem:[#allocation2 + $0x1ec] ss:$16 sps:$4 sm:$0xff]  }
  0x34   :  { %872 = vmatpush2.bf16.msra.mxu1 %v1223_v39  ;;  %832 = vmatprep.subr.bf16.mxu0 %v1224_v40  ;;  %v1317_v39 = vld [vmem:[#allocation2 + $0x3ec] ss:$16 sps:$4 sm:$0xff]   ;;  %v1312_v40 = vld [vmem:[#allocation2 + $0x1e8] ss:$16 sps:$4 sm:$0xff]  }
  0x35   :  { %873 = vmatprep.subr.bf16.mxu1 %v1226_v41  ;;  %v1315_v41 = vld [vmem:[#allocation2 + $0x3e8] ss:$16 sps:$4 sm:$0xff]  }
  0x37   :  { %833 = vmatpush2.bf16.msra.mxu0 %v1228_v42  ;;  %v1320_v42 = vld [vmem:[#allocation2 + $0x1cc] ss:$16 sps:$4 sm:$0xff]  }
  0x38   :  { %874 = vmatpush2.bf16.msra.mxu1 %v1229_v43  ;;  %834 = vmatprep.subr.bf16.mxu0 %v1230_v44  ;;  %v1323_v43 = vld [vmem:[#allocation2 + $0x3cc] ss:$16 sps:$4 sm:$0xff]   ;;  %v1318_v44 = vld [vmem:[#allocation2 + $0x1c8] ss:$16 sps:$4 sm:$0xff]  }
  0x39   :  { %875 = vmatprep.subr.bf16.mxu1 %v1232_v45  ;;  %v1321_v45 = vld [vmem:[#allocation2 + $0x3c8] ss:$16 sps:$4 sm:$0xff]  }
  0x3b   :  { %835 = vmatpush2.bf16.msra.mxu0 %v1234_v49  ;;  %v1327_v49 = vld [vmem:[#allocation2 + $0x3a8] ss:$16 sps:$4 sm:$0xff]  }
  0x3c   :  { %876 = vmatpush2.bf16.msra.mxu1 %v1235_v50  ;;  %836 = vmatprep.subr.bf16.mxu0 %v1236_v52  ;;  %v1332_v50 = vld [vmem:[#allocation2 + $0x18c] ss:$16 sps:$4 sm:$0xff]   ;;  %v1330_v52 = vld [vmem:[#allocation2 + $0x188] ss:$16 sps:$4 sm:$0xff]  }
  0x3d   :  { %877 = vmatprep.subr.bf16.mxu1 %v1238_v53  ;;  %v1333_v53 = vld [vmem:[#allocation2 + $0x388] ss:$16 sps:$4 sm:$0xff]  }
  0x3f   :  { %837 = vmatpush2.bf16.msra.mxu0 %v1240_v54  ;;  %v1338_v54 = vld [vmem:[#allocation2 + $0x16c] ss:$16 sps:$4 sm:$0xff]  }
  0x40   :  { %878 = vmatpush2.bf16.msra.mxu1 %v1241_v55  ;;  %838 = vmatprep.subr.bf16.mxu0 %v1242_v56  ;;  %v1341_v55 = vld [vmem:[#allocation2 + $0x36c] ss:$16 sps:$4 sm:$0xff]   ;;  %v1336_v56 = vld [vmem:[#allocation2 + $0x168] ss:$16 sps:$4 sm:$0xff]  }
  0x41   :  { %879 = vmatprep.subr.bf16.mxu1 %v1244_v57  ;;  %v1339_v57 = vld [vmem:[#allocation2 + $0x368] ss:$16 sps:$4 sm:$0xff]  }
  0x43   :  { %839 = vmatpush2.bf16.msra.mxu0 %v1246_v58  ;;  %v1344_v58 = vld [vmem:[#allocation2 + $0x14c] ss:$16 sps:$4 sm:$0xff]  }
  0x44   :  { %880 = vmatpush2.bf16.msra.mxu1 %v1247_v59  ;;  %840 = vmatprep.subr.bf16.mxu0 %v1248_v60  ;;  %v1347_v59 = vld [vmem:[#allocation2 + $0x34c] ss:$16 sps:$4 sm:$0xff]   ;;  %v1342_v60 = vld [vmem:[#allocation2 + $0x148] ss:$16 sps:$4 sm:$0xff]  }
  0x45   :  { %881 = vmatprep.subr.bf16.mxu1 %v1250_v61  ;;  %v1345_v61 = vld [vmem:[#allocation2 + $0x348] ss:$16 sps:$4 sm:$0xff]  }
  0x47   :  { %841 = vmatpush2.bf16.msra.mxu0 %v1252_v62  ;;  %v1350_v62 = vld [vmem:[#allocation2 + $0x12c] ss:$16 sps:$4 sm:$0xff]  }
  0x48   :  { %882 = vmatpush2.bf16.msra.mxu1 %v1253_v63  ;;  %842 = vmatprep.subr.bf16.mxu0 %v1254_v0  ;;  %v1353_v63 = vld [vmem:[#allocation2 + $0x32c] ss:$16 sps:$4 sm:$0xff]   ;;  %v1348_v0 = vld [vmem:[#allocation2 + $0x128] ss:$16 sps:$4 sm:$0xff]  }
  0x49   :  { %883 = vmatprep.subr.bf16.mxu1 %v1256_v1  ;;  %v1351_v1 = vld [vmem:[#allocation2 + $0x328] ss:$16 sps:$4 sm:$0xff]  }
  0x4b   :  { %843 = vmatpush2.bf16.msra.mxu0 %v1258_v2  ;;  %v1356_v2 = vld [vmem:[#allocation2 + $0x10c] ss:$16 sps:$4 sm:$0xff]  }
  0x4c   :  { %884 = vmatpush2.bf16.msra.mxu1 %v1259_v3  ;;  %894 = vmatprep.subr.bf16.mxu0 %v1266_v4  ;;  %v1359_v3 = vld [vmem:[#allocation2 + $0x30c] ss:$16 sps:$4 sm:$0xff]   ;;  %v1354_v4 = vld [vmem:[#allocation2 + $0x108] ss:$16 sps:$4 sm:$0xff]  }
  0x4d   :  { %935 = vmatprep.subr.bf16.mxu1 %v1269_v5  ;;  %v1357_v5 = vld [vmem:[#allocation2 + $0x308] ss:$16 sps:$4 sm:$0xff]  }
  0x4e   :  { %845 = vmatmul.mubr.bf16.vlgmr.msra.gmra.mxu0 %v1417_v6 }
  0x4f   :  { %886 = vmatmul.mubr.bf16.vlgmr.msra.gmra.mxu1 %v1419_v7  ;;  %895 = vmatpush1.bf16.msra.mxu0 %v1264_v8 }
  0x50   :  { %936 = vmatpush1.bf16.msra.mxu1 %v1267_v9  ;;  %896 = vmatprep.subr.bf16.mxu0 %v1272_v10 }
  0x51   :  { %937 = vmatprep.subr.bf16.mxu1 %v1275_v11  ;;  %926 = vmatprep.mubr.bf16.mxu0 %v1411_v47  ;;  %v1329_v47 = vld [vmem:[#allocation2 + $0x3ac] ss:$16 sps:$4 sm:$0xff]  }
  0x52   :  { %967 = vmatprep.mubr.bf16.mxu1 %v1030_v51  ;;  %v1335_v51 = vld [vmem:[#allocation2 + $0x38c] ss:$16 sps:$4 sm:$0xff]  }
  0x53   :  { %897 = vmatpush1.bf16.msra.mxu0 %v1270_v12 }
  0x54   :  { %938 = vmatpush1.bf16.msra.mxu1 %v1273_v13  ;;  %898 = vmatprep.subr.bf16.mxu0 %v1278_v14 }
  0x55   :  { %939 = vmatprep.subr.bf16.mxu1 %v1281_v15 }
  0x57   :  { %899 = vmatpush1.bf16.msra.mxu0 %v1276_v16  ;;  %v985_v16 = vlaneseq }
  0x58   :  { %940 = vmatpush1.bf16.msra.mxu1 %v1279_v17  ;;  %900 = vmatprep.subr.bf16.mxu0 %v1284_v18 }
  0x59   :  { %941 = vmatprep.subr.bf16.mxu1 %v1287_v19  ;;  %v986_v17 = vshrl.u32 %v985_v16, 7 }
  0x5b   :  { %901 = vmatpush1.bf16.msra.mxu0 %v1282_v20  ;;  %v987_v18 = vsub.s32 0, %v986_v17  ;;  %v1159_v20 = vld [vmem:[%s1452_s2 + $0x10] ss:$8 sm:$0x3] }
  0x5c   :  { %942 = vmatpush1.bf16.msra.mxu1 %v1285_v21  ;;  %902 = vmatprep.subr.bf16.mxu0 %v1290_v22  ;;  %v991_v22 = vsub.s32 1, %v986_v17 }
  0x5d   :  { %943 = vmatprep.subr.bf16.mxu1 %v1293_v23  ;;  %v977_v23 = vld [vmem:[%s1452_s2 + $0x8] sm:$0xff] }
  0x5f   :  { %903 = vmatpush1.bf16.msra.mxu0 %v1288_v24  ;;  %v1001_v24 = vrot.slane %v1159_v20, %v987_v18 }
  0x60   :  { %944 = vmatpush1.bf16.msra.mxu1 %v1291_v25  ;;  %904 = vmatprep.subr.bf16.mxu0 %v1296_v26 }
  0x61   :  { %945 = vmatprep.subr.bf16.mxu1 %v1299_v27 }
  0x63   :  { %905 = vmatpush1.bf16.msra.mxu0 %v1294_v28 }
  0x64   :  { %946 = vmatpush1.bf16.msra.mxu1 %v1297_v29  ;;  %906 = vmatprep.subr.bf16.mxu0 %v1302_v30  ;;  %v1005_v29 = vrot.slane %v1159_v20, %v991_v22 }
  0x65   :  { %947 = vmatprep.subr.bf16.mxu1 %v1305_v31 }
  0x67   :  { %907 = vmatpush1.bf16.msra.mxu0 %v1300_v32 }
  0x68   :  { %948 = vmatpush1.bf16.msra.mxu1 %v1303_v33  ;;  %908 = vmatprep.subr.bf16.mxu0 %v1308_v34 }
  0x69   :  { %949 = vmatprep.subr.bf16.mxu1 %v1311_v35 }
  0x6b   :  { %909 = vmatpush1.bf16.msra.mxu0 %v1306_v36 }
  0x6c   :  { %950 = vmatpush1.bf16.msra.mxu1 %v1309_v37  ;;  %910 = vmatprep.subr.bf16.mxu0 %v1314_v38 }
  0x6d   :  { %951 = vmatprep.subr.bf16.mxu1 %v1317_v39 }
  0x6f   :  { %911 = vmatpush2.bf16.msra.mxu0 %v1312_v40 }
  0x70   :  { %952 = vmatpush2.bf16.msra.mxu1 %v1315_v41  ;;  %912 = vmatprep.subr.bf16.mxu0 %v1320_v42 }
  0x71   :  { %953 = vmatprep.subr.bf16.mxu1 %v1323_v43 }
  0x73   :  { %913 = vmatpush2.bf16.msra.mxu0 %v1318_v44 }
  0x74   :  { %954 = vmatpush2.bf16.msra.mxu1 %v1321_v45  ;;  %914 = vmatprep.subr.bf16.mxu0 %v1326_v46 }
  0x75   :  { %955 = vmatprep.subr.bf16.mxu1 %v1329_v47 }
  0x77   :  { %915 = vmatpush2.bf16.msra.mxu0 %v1324_v48 }
  0x78   :  { %956 = vmatpush2.bf16.msra.mxu1 %v1327_v49  ;;  %916 = vmatprep.subr.bf16.mxu0 %v1332_v50 }
  0x79   :  { %957 = vmatprep.subr.bf16.mxu1 %v1335_v51 }
  0x7b   :  { %917 = vmatpush2.bf16.msra.mxu0 %v1330_v52 }
  0x7c   :  { %958 = vmatpush2.bf16.msra.mxu1 %v1333_v53  ;;  %918 = vmatprep.subr.bf16.mxu0 %v1338_v54 }
  0x7d   :  { %959 = vmatprep.subr.bf16.mxu1 %v1341_v55 }
  0x7f   :  { %919 = vmatpush2.bf16.msra.mxu0 %v1336_v56 }
  0x80   :  { %960 = vmatpush2.bf16.msra.mxu1 %v1339_v57  ;;  %920 = vmatprep.subr.bf16.mxu0 %v1344_v58 }
  0x81   :  { %961 = vmatprep.subr.bf16.mxu1 %v1347_v59 }
  0x83   :  { %921 = vmatpush2.bf16.msra.mxu0 %v1342_v60 }
  0x84   :  { %962 = vmatpush2.bf16.msra.mxu1 %v1345_v61  ;;  %922 = vmatprep.subr.bf16.mxu0 %v1350_v62 }
  0x85   :  { %963 = vmatprep.subr.bf16.mxu1 %v1353_v63 }
  0x87   :  { %923 = vmatpush2.bf16.msra.mxu0 %v1348_v0 }
  0x88   :  { %964 = vmatpush2.bf16.msra.mxu1 %v1351_v1  ;;  %924 = vmatprep.subr.bf16.mxu0 %v1356_v2 }
  0x89   :  { %965 = vmatprep.subr.bf16.mxu1 %v1359_v3 }
  0x8b   :  { %925 = vmatpush2.bf16.msra.mxu0 %v1354_v4 }
  0x8c   :  { %966 = vmatpush2.bf16.msra.mxu1 %v1357_v5 }
  0x8e   :  { %927 = vmatmul.mubr.bf16.vlgmr.msra.gmra.mxu0 %v1417_v6  ;;  %v976_v6 = vld [vmem:[%s1452_s2] sm:$0xff] }
  0x8f   :  { %968 = vmatmul.mubr.bf16.vlgmr.msra.gmra.mxu1 %v1419_v7  ;;  %v1160_v7 = vld [vmem:[%s1452_s2 + $0x11] ss:$8 sm:$0x3] }
  0x90   :  { %v988_v26 = vrot.slane %v1160_v7, %v987_v18  ;;  %v992_v28 = vrot.slane %v1160_v7, %v991_v22 }
 0x10e   :  { %v846_v8 = vpop.f32.mrf.mxu0 }
 0x10f   :  { %v887_v9 = vpop.f32.mrf.mxu1 }
 0x110   :  { %v848_v10 = vpop.f32.mrf.mxu0  ;;  %v888_v19 = vadd.f32 %v887_v9, %v846_v8 }
 0x111   :  { %v889_v11 = vpop.f32.mrf.mxu1 }
 0x112   :  { %v850_v12 = vpop.f32.mrf.mxu0  ;;  %v890_v21 = vadd.f32 %v889_v11, %v848_v10  ;;  %v982_v25 = vmul.f32 %v976_v6, %v888_v19  ;;  %v1016_v33 = vmul.f32 %v1001_v24, %v888_v19 }
 0x113   :  { %v891_v13 = vpop.f32.mrf.mxu1 }
 0x114   :  { %v851_v14 = vpop.f32.mrf.mxu0  ;;  %v983_v27 = vmul.f32 %v977_v23, %v890_v21  ;;  %v995_v36 = vadd.f32 %v988_v26, %v982_v25  ;;  %v1017_v41 = vmul.f32 %v1005_v29, %v890_v21 }
 0x115   :  { %v892_v15 = vpop.f32.mrf.mxu1 }
 0x116   :  { %v996_v40 = vadd.f32 %v992_v28, %v983_v27 }
 0x14e   :  { %v928_v30 = vpop.f32.mrf.mxu0 }
 0x14f   :  { %v969_v31 = vpop.f32.mrf.mxu1 }
 0x150   :  { %v970_v32 = vadd.f32 %v969_v31, %v928_v30  ;;  %v930_v34 = vpop.f32.mrf.mxu0 }
 0x151   :  { %v971_v35 = vpop.f32.mrf.mxu1 }
 0x152   :  { %v1008_v37 = vmul.f32 %v1001_v24, %v970_v32  ;;  %v1014_v38 = vmul.f32 %v976_v6, %v970_v32  ;;  %v972_v39 = vadd.f32 %v971_v35, %v930_v34  ;;  %v932_v42 = vpop.f32.mrf.mxu0 }
 0x153   :  { %v973_v43 = vpop.f32.mrf.mxu1 }
 0x154   :  { %v1010_v44 = vsub.f32 %v995_v36, %v1008_v37  ;;  %v1018_v45 = vadd.f32 %v1016_v33, %v1014_v38  ;;  %v1009_v46 = vmul.f32 %v1005_v29, %v972_v39  ;;  %v1015_v47 = vmul.f32 %v977_v23, %v972_v39  ;;  %v933_v48 = vpop.f32.mrf.mxu0 }
 0x155   :  { %v974_v49 = vpop.f32.mrf.mxu1 }
 0x156   :  { %1012 = vst [vmem:[%s1453_s3] sm:$0xff] %v1010_v44  ;;  %1020 = vst [vmem:[%s1453_s3 + $0x10] sm:$0xff] %v1018_v45  ;;  %v1011_v50 = vsub.f32 %v996_v40, %v1009_v46  ;;  %v1019_v51 = vadd.f32 %v1017_v41, %v1015_v47 }
 0x158   :  { %1013 = vst [vmem:[%s1453_s3 + $0x8] sm:$0xff] %v1011_v50  ;;  %1021 = vst [vmem:[%s1453_s3 + $0x18] sm:$0xff] %v1019_v51 }
 0x159   :  { %1026 = vsyncpa [#allocation3], 1 }

</bundles_post_ra>
